<compile_context>
chip_gen: v5e
topology: v5e:2x2
jax: 0.10.0
libtpu: 0.0.40
codegen_flags: <defaults>
</compile_context>

<pallas_src>
import functools

import jax
import jax.numpy as jnp
from jax.experimental import pallas as pl
from jax.experimental.pallas import tpu as pltpu

NEG_SLOPE = 0.01  # F.leaky_relu default negative_slope


def _leaky_relu(x):
    return jnp.where(x > 0, x, NEG_SLOPE * x)


def mlp_kernel(xt_ref, w1_ref, b1_ref, w2_ref, b2_ref, w3_ref, b3_ref, ot_ref):
    # xt_ref: [x_dim_p, bt]   (batch along lanes)
    # w1: [nf_p, x_dim_p]  w2: [nf_p, nf_p]  w3: [out_dim, nf_p]
    # b1/b2: [nf_p, 1]     b3: [out_dim, 1]   (f32, added post-accumulate)
    xt = xt_ref[...]
    h = jnp.dot(w1_ref[...], xt, preferred_element_type=jnp.float32)
    h = _leaky_relu(h + b1_ref[...])
    h = jnp.dot(w2_ref[...], h.astype(w2_ref.dtype),
                preferred_element_type=jnp.float32)
    h = _leaky_relu(h + b2_ref[...])
    out = jnp.dot(w3_ref[...], h.astype(w3_ref.dtype),
                  preferred_element_type=jnp.float32)
    ot_ref[...] = (out + b3_ref[...]).astype(ot_ref.dtype)


def _round_up(n, m):
    return ((n + m - 1) // m) * m


def _pad2d(a, rows, cols):
    return jnp.pad(a, ((0, rows - a.shape[0]), (0, cols - a.shape[1])))


def _pick_batch_tile(B, max_tile=512):
    """Largest 128-multiple tile <= max_tile dividing B, preferring >=2 grid
    steps (keeps both v7x TensorCores busy).  Tiny/ragged batches -> single
    full-batch grid step (block == full array, so no (8,128) constraint)."""
    if B % 128 != 0:
        return B
    candidate = min(max_tile, B // 2 if (B // 2) % 128 == 0 else B)
    tile = (candidate // 128) * 128
    while tile >= 128:
        if B % tile == 0:
            return tile
        tile -= 128
    return B


def network_fc_forward(x, params, *, compute_dtype=jnp.float32, max_tile=512):
    """x: [B, x_dim] float32.
    params (PyTorch Linear layout): w_i [out, in], b_i [out]."""
    B, x_dim = x.shape
    num_feat = params["w1"].shape[0]
    out_dim = params["w3"].shape[0]

    xd_p = _round_up(x_dim, 8)
    nf_p = _round_up(num_feat, 8)

    # Zero-pad feature dims once (padded units stay exactly zero end-to-end).
    w1 = _pad2d(params["w1"], nf_p, xd_p).astype(compute_dtype)
    b1 = _pad2d(params["b1"].reshape(num_feat, 1), nf_p, 1).astype(jnp.float32)
    w2 = _pad2d(params["w2"], nf_p, nf_p).astype(compute_dtype)
    b2 = _pad2d(params["b2"].reshape(num_feat, 1), nf_p, 1).astype(jnp.float32)
    w3 = _pad2d(params["w3"], out_dim, nf_p).astype(compute_dtype)
    b3 = params["b3"].reshape(out_dim, 1).astype(jnp.float32)

    # Transposed, padded input: [x_dim_p, B], batch along lanes.
    xt = _pad2d(x.T, xd_p, B).astype(compute_dtype)

    batch_tile = _pick_batch_tile(B, max_tile=max_tile)
    assert B % batch_tile == 0
    grid = (B // batch_tile,)

    itemsize = jnp.dtype(compute_dtype).itemsize
    flops = 2 * B * (xd_p * nf_p + nf_p * nf_p + nf_p * out_dim)
    bytes_accessed = (
        xt.size * itemsize
        + (w1.size + w2.size + w3.size) * itemsize
        + (b1.size + b2.size + b3.size) * 4
        + out_dim * B * 4
    )

    in_specs = [
        pl.BlockSpec((xd_p, batch_tile), lambda i: (0, i)),   # x^T tile
        pl.BlockSpec((nf_p, xd_p), lambda i: (0, 0)),         # w1
        pl.BlockSpec((nf_p, 1), lambda i: (0, 0)),            # b1
        pl.BlockSpec((nf_p, nf_p), lambda i: (0, 0)),         # w2
        pl.BlockSpec((nf_p, 1), lambda i: (0, 0)),            # b2
        pl.BlockSpec((out_dim, nf_p), lambda i: (0, 0)),      # w3
        pl.BlockSpec((out_dim, 1), lambda i: (0, 0)),         # b3
    ]
    out_specs = pl.BlockSpec((out_dim, batch_tile), lambda i: (0, i))

    out_t = pl.pallas_call(
        mlp_kernel,
        out_shape=jax.ShapeDtypeStruct((out_dim, B), jnp.float32),
        grid=grid,
        in_specs=in_specs,
        out_specs=out_specs,
        compiler_params=pltpu.CompilerParams(
            dimension_semantics=("parallel",),
            vmem_limit_bytes=32 * 1024 * 1024,  # sized for v7x's 32 MiB scoped VMEM
        ),
        cost_estimate=pl.CostEstimate(
            flops=flops, transcendentals=0, bytes_accessed=bytes_accessed),
    )(xt, w1, b1, w2, b2, w3, b3)

    return out_t.T  # [B, out_dim]


def init_params(key, x_dim, num_feat=30, out_dim=1):
    """nn.Linear-style init, PyTorch layout: w [out, in], b [out]."""
    ks = jax.random.split(key, 6)

    def lin(kw, kb, fan_in, fan_out):
        bound = 1.0 / jnp.sqrt(jnp.float32(fan_in))
        w = jax.random.uniform(kw, (fan_out, fan_in), jnp.float32, -bound, bound)
        b = jax.random.uniform(kb, (fan_out,), jnp.float32, -bound, bound)
        return w, b

    w1, b1 = lin(ks[0], ks[1], x_dim, num_feat)
    w2, b2 = lin(ks[2], ks[3], num_feat, num_feat)
    w3, b3 = lin(ks[4], ks[5], num_feat, out_dim)
    return {"w1": w1, "b1": b1, "w2": w2, "b2": b2, "w3": w3, "b3": b3}


def reference_forward(x, p):
    h = jax.nn.leaky_relu(x @ p["w1"].T + p["b1"], NEG_SLOPE)
    h = jax.nn.leaky_relu(h @ p["w2"].T + p["b2"], NEG_SLOPE)
    return h @ p["w3"].T + p["b3"]


if __name__ == "__main__":
    key = jax.random.PRNGKey(0)
    k_x, k_p = jax.random.split(key)

    B, X_DIM, NUM_FEAT, OUT_DIM = 256, 8, 30, 1
    x = jax.random.normal(k_x, (B, X_DIM), jnp.float32)
    params = init_params(k_p, X_DIM, NUM_FEAT, OUT_DIM)

    # f32 path (exact check) — grid has 2 parallel 128-row steps for B=256.
    out = jax.block_until_ready(network_fc_forward(x, params))
    ref = reference_forward(x, params)
    assert out.shape == (B, OUT_DIM)
    assert jnp.allclose(out, ref, atol=1e-5, rtol=1e-5)

    # bf16 operand path (MXU-native on v6e/v7x), f32 accumulation — loose check.
    out_bf16 = jax.block_until_ready(
        network_fc_forward(x, params, compute_dtype=jnp.bfloat16))
    assert out_bf16.shape == (B, OUT_DIM)
    assert jnp.allclose(out_bf16, ref, atol=5e-2, rtol=5e-2)

    # Tiny ragged batch falls back to a single full-batch grid step.
    out_small = jax.block_until_ready(network_fc_forward(x[:16], params))
    assert jnp.allclose(out_small, ref[:16], atol=1e-5, rtol=1e-5)

    print("KERNEL_OK")
</pallas_src>

<mosaic_0001>
module attributes {stable_mosaic.version = 11 : i64} {
  func.func @mlp_kernel(%arg0: i32, %arg1: memref<8x128xf32, #tpu.memory_space<vmem>>, %arg2: memref<32x8xf32, #tpu.memory_space<vmem>>, %arg3: memref<32x1xf32, #tpu.memory_space<vmem>>, %arg4: memref<32x32xf32, #tpu.memory_space<vmem>>, %arg5: memref<32x1xf32, #tpu.memory_space<vmem>>, %arg6: memref<1x32xf32, #tpu.memory_space<vmem>>, %arg7: memref<1x1xf32, #tpu.memory_space<vmem>>, %arg8: memref<1x128xf32, #tpu.memory_space<vmem>>) attributes {dimension_semantics = [#tpu.dimension_semantics<parallel>], iteration_bounds = array<i64: 2>, scalar_prefetch = 0 : i64, scratch_operands = 0 : i64, tpu.core_type = #tpu.core_type<tc>, window_params = [{transform_indices = @transform_0, window_bounds = array<i64: 8, 128>}, {pipeline_mode = #tpu.pipeline_mode<synchronous>, transform_indices = @transform_1, window_bounds = array<i64: 32, 8>}, {pipeline_mode = #tpu.pipeline_mode<synchronous>, transform_indices = @transform_2, window_bounds = array<i64: 32, 1>}, {pipeline_mode = #tpu.pipeline_mode<synchronous>, transform_indices = @transform_3, window_bounds = array<i64: 32, 32>}, {pipeline_mode = #tpu.pipeline_mode<synchronous>, transform_indices = @transform_4, window_bounds = array<i64: 32, 1>}, {pipeline_mode = #tpu.pipeline_mode<synchronous>, transform_indices = @transform_5, window_bounds = array<i64: 1, 32>}, {pipeline_mode = #tpu.pipeline_mode<synchronous>, transform_indices = @transform_6, window_bounds = array<i64: 1, 1>}, {transform_indices = @transform_7, window_bounds = array<i64: 1, 128>}]} {
    %c0 = arith.constant 0 : index
    %c0_0 = arith.constant 0 : index
    %0 = vector.load %arg1[%c0, %c0_0] : memref<8x128xf32, #tpu.memory_space<vmem>>, vector<8x128xf32>
    %c0_1 = arith.constant 0 : index
    %c0_2 = arith.constant 0 : index
    %1 = vector.load %arg2[%c0_1, %c0_2] : memref<32x8xf32, #tpu.memory_space<vmem>>, vector<32x8xf32>
    %cst = arith.constant dense<0.000000e+00> : vector<32x128xf32>
    %2 = tpu.matmul %1, %0, %cst {dimension_numbers = #tpu.dot_dimension_numbers<[1], [0], [0], [1], [0, 0, 1, 1], [], []>} : vector<32x8xf32>, vector<8x128xf32>, vector<32x128xf32> -> vector<32x128xf32>
    %c0_3 = arith.constant 0 : index
    %c0_4 = arith.constant 0 : index
    %3 = vector.load %arg3[%c0_3, %c0_4] : memref<32x1xf32, #tpu.memory_space<vmem>>, vector<32x1xf32>
    %4 = vector.broadcast %3 : vector<32x1xf32> to vector<32x128xf32>
    %5 = arith.addf %2, %4 : vector<32x128xf32>
    %cst_5 = arith.constant 0.000000e+00 : f32
    %6 = vector.broadcast %cst_5 : f32 to vector<32x128xf32>
    %7 = arith.cmpf ogt, %5, %6 : vector<32x128xf32>
    %cst_6 = arith.constant 0.00999999977 : f32
    %8 = vector.broadcast %cst_6 : f32 to vector<32x128xf32>
    %9 = arith.mulf %8, %5 : vector<32x128xf32>
    %10 = arith.select %7, %5, %9 : vector<32x128xi1>, vector<32x128xf32>
    %c0_7 = arith.constant 0 : index
    %c0_8 = arith.constant 0 : index
    %11 = vector.load %arg4[%c0_7, %c0_8] : memref<32x32xf32, #tpu.memory_space<vmem>>, vector<32x32xf32>
    %cst_9 = arith.constant dense<0.000000e+00> : vector<32x128xf32>
    %12 = tpu.matmul %11, %10, %cst_9 {dimension_numbers = #tpu.dot_dimension_numbers<[1], [0], [0], [1], [0, 0, 1, 1], [], []>} : vector<32x32xf32>, vector<32x128xf32>, vector<32x128xf32> -> vector<32x128xf32>
    %c0_10 = arith.constant 0 : index
    %c0_11 = arith.constant 0 : index
    %13 = vector.load %arg5[%c0_10, %c0_11] : memref<32x1xf32, #tpu.memory_space<vmem>>, vector<32x1xf32>
    %14 = vector.broadcast %13 : vector<32x1xf32> to vector<32x128xf32>
    %15 = arith.addf %12, %14 : vector<32x128xf32>
    %cst_12 = arith.constant 0.000000e+00 : f32
    %16 = vector.broadcast %cst_12 : f32 to vector<32x128xf32>
    %17 = arith.cmpf ogt, %15, %16 : vector<32x128xf32>
    %cst_13 = arith.constant 0.00999999977 : f32
    %18 = vector.broadcast %cst_13 : f32 to vector<32x128xf32>
    %19 = arith.mulf %18, %15 : vector<32x128xf32>
    %20 = arith.select %17, %15, %19 : vector<32x128xi1>, vector<32x128xf32>
    %c0_14 = arith.constant 0 : index
    %c0_15 = arith.constant 0 : index
    %21 = vector.load %arg6[%c0_14, %c0_15] : memref<1x32xf32, #tpu.memory_space<vmem>>, vector<1x32xf32>
    %cst_16 = arith.constant dense<0.000000e+00> : vector<1x128xf32>
    %22 = tpu.matmul %21, %20, %cst_16 {dimension_numbers = #tpu.dot_dimension_numbers<[1], [0], [0], [1], [0, 0, 1, 1], [], []>} : vector<1x32xf32>, vector<32x128xf32>, vector<1x128xf32> -> vector<1x128xf32>
    %c0_17 = arith.constant 0 : index
    %c0_18 = arith.constant 0 : index
    %23 = vector.load %arg7[%c0_17, %c0_18] : memref<1x1xf32, #tpu.memory_space<vmem>>, vector<1x1xf32>
    %24 = vector.broadcast %23 : vector<1x1xf32> to vector<1x128xf32>
    %25 = arith.addf %22, %24 : vector<1x128xf32>
    %c0_19 = arith.constant 0 : index
    %c0_20 = arith.constant 0 : index
    %26 = vector.load %arg8[%c0_19, %c0_20] : memref<1x128xf32, #tpu.memory_space<vmem>>, vector<1x128xf32>
    tpu.vector_store %arg8[%c0_19, %c0_20], %25 {strides = array<i32>} : memref<1x128xf32, #tpu.memory_space<vmem>>, vector<1x128xf32>,
    return
  }
  func.func @transform_0(%arg0: i32) -> (i32, i32) {
    %c0_i32 = arith.constant 0 : i32
    %c0_i32_0 = arith.constant 0 : i32
    return %c0_i32, %arg0 : i32, i32
  }
  func.func @transform_1(%arg0: i32) -> (i32, i32) {
    %c0_i32 = arith.constant 0 : i32
    %c0_i32_0 = arith.constant 0 : i32
    %c0_i32_1 = arith.constant 0 : i32
    return %c0_i32, %c0_i32_0 : i32, i32
  }
  func.func @transform_2(%arg0: i32) -> (i32, i32) {
    %c0_i32 = arith.constant 0 : i32
    %c0_i32_0 = arith.constant 0 : i32
    %c0_i32_1 = arith.constant 0 : i32
    return %c0_i32, %c0_i32_0 : i32, i32
  }
  func.func @transform_3(%arg0: i32) -> (i32, i32) {
    %c0_i32 = arith.constant 0 : i32
    %c0_i32_0 = arith.constant 0 : i32
    %c0_i32_1 = arith.constant 0 : i32
    return %c0_i32, %c0_i32_0 : i32, i32
  }
  func.func @transform_4(%arg0: i32) -> (i32, i32) {
    %c0_i32 = arith.constant 0 : i32
    %c0_i32_0 = arith.constant 0 : i32
    %c0_i32_1 = arith.constant 0 : i32
    return %c0_i32, %c0_i32_0 : i32, i32
  }
  func.func @transform_5(%arg0: i32) -> (i32, i32) {
    %c0_i32 = arith.constant 0 : i32
    %c0_i32_0 = arith.constant 0 : i32
    %c0_i32_1 = arith.constant 0 : i32
    return %c0_i32, %c0_i32_0 : i32, i32
  }
  func.func @transform_6(%arg0: i32) -> (i32, i32) {
    %c0_i32 = arith.constant 0 : i32
    %c0_i32_0 = arith.constant 0 : i32
    %c0_i32_1 = arith.constant 0 : i32
    return %c0_i32, %c0_i32_0 : i32, i32
  }
  func.func @transform_7(%arg0: i32) -> (i32, i32) {
    %c0_i32 = arith.constant 0 : i32
    %c0_i32_0 = arith.constant 0 : i32
    return %c0_i32, %arg0 : i32, i32
  }
}

</mosaic_0001>

<bundles_post_ra>
// kernel: tpu_custom_call.1
= control target key start
LH: loop header
LB: loop body
LE: loop exit
PB: predicated region body
PF: predicated region fallthrough
CT: control target
= control target key end

     0   :  { %s857_s0 = inlined_call_operand.vmem [shape: f32[8,256], index: 0, kind: input, shape index: {}]   ;;  %s858_s1 = inlined_call_operand.vmem [shape: f32[32,8], index: 1, kind: input, shape index: {}]   ;;  %s859_s2 = inlined_call_operand.vmem [shape: f32[32,1], index: 2, kind: input, shape index: {}]   ;;  %s860_s3 = inlined_call_operand.vmem [shape: f32[32,32], index: 3, kind: input, shape index: {}]   ;;  %s861_s4 = inlined_call_operand.vmem [shape: f32[32,1], index: 4, kind: input, shape index: {}]   ;;  %s862_s5 = inlined_call_operand.vmem [shape: f32[1,32], index: 5, kind: input, shape index: {}]   ;;  %s863_s6 = inlined_call_operand.<no memory space> [shape: f32[1,1], index: 6, kind: input, shape index: {}]   ;;  %s864_s7 = inlined_call_operand.hbm [shape: f32[1,256], index: 7, kind: output, shape index: {}]  }
   0x1   :  { %v12_v0 = vstv %s863_s6 }
   0x2   :  { %13 = vst [vmem:[#allocation2] sm:$0x1] %v12_v0 }
   0x3   :  { %14 = vsyncpa [#allocation4], 0 }
   0x4   :  { %16 = vsyncpa [#allocation4 + $0x1], 0  ;;  %s712_s26 = smov 0   ;;  %s714_s27 = smov 0  }
   0x5   :  { %s716_s28 = smov 0   ;;  %s718_s29 = smov 0  }
   0x6 LB: > { %s733_s6 = sadd.s32 4294967295, %s666_s29   ;;  %s540_s30 = sadd.s32 4294967294, %s666_s29   ;;  %s666_s29 = sphi %s718_s29, %s870_s29   ;;  %s662_s28 = sphi %s716_s28, %s869_s28   ;;  %s658_s27 = sphi %s714_s27, %s868_s27   ;;  %s654_s26 = sphi %s712_s26, %s867_s26  }
   0x7   : > { %s737_s8 = sadd.s32 1, %s666_s29   ;;  %s181_s9 = sadd.s32 1, %s662_s28 }
   0x8   : > { %s178_s10 = ssub.s32 %s666_s29, %s737_s8  ;;  %p191_p0 = scmp.ne.s32.totalorder %s662_s28, %s658_s27 }
   0x9   : > { %p179_p1 = scmp.eq.s32.totalorder %s178_s10, 0  ;;  %p192_p2 = scmp.eq.s32.totalorder %s733_s6, 1 }
   0xa   : > { %p197_p3 = scmp.ne.s32.totalorder %s658_s27, %s654_s26  ;;  %p198_p4 = scmp.eq.s32.totalorder %s540_s30, 1 }
   0xb   : > { %s748_s11 = scalar_select %p179_p1, %s662_s28, %s181_s9  }
   0xc   : > { %p750_p5 = por %p192_p2, %p191_p0  ;;  %p754_p6 = por %p198_p4, %p197_p3 }
   0xd   : > { %p543_p7 = scmp.ge.s32.totalorder %s666_s29, 1  ;;  %p241_p8 = scmp.lt.s32.totalorder %s666_s29, 3 }
   0xf   : > { %p242_p9 = pnand %p543_p7, %p241_p8 }
  0x10   : > { %p271_p10 = scmp.lt.s32.totalorder (!%p242_p9), %s733_s6, 1  ;;  %s269_s23 = sand.u32 (!%p242_p9), 1, %s658_s27  }
  0x11   : > { %245 = sbr.rel (%p242_p9) target bundleno = 469 (0x1d5), region = 48  ;;  %s481_s30 = scalar_lea.hbm (!%p242_p9), %s864_s7, %s733_s6 }
  0x12   : > { %s270_s9 = scalar_lea.vmem (!%p242_p9), [#allocation3], %s269_s23  ;;  %s485_s14 = sshll.u32 (!%p242_p9), %s481_s30, 4  ;;  %s486_s14 = int_to_ptr.hbm [resolvable:$true] %s485_s14 }
  0x13   : > { %s483_s10 = sshll.u32 (!%p242_p9), %s270_s9, 4  ;;  %s473_s15 = scalar_lea.sflag (!%p242_p9), [#allocation4], %s269_s23  ;;  %s484_s10 = int_to_ptr.vmem [resolvable:$true] %s483_s10 }
  0x14   : > { %s618_s16 = sshra.s32 (!%p242_p9), %s486_s14, 4  ;;  %s619_s16 = int_to_ptr.hbm [resolvable:$true] %s618_s16 }
  0x15   : > { %s620_s17 = scalar_lea.hbm (!%p242_p9), %s619_s16, 1  ;;  %p625_p0 = scmp.lt.s32.totalorder (!%p242_p9), %s619_s16, %s864_s7 }
  0x16   : > { %v283_v1 = vld [vmem:[%s859_s2 + $0x18] sm:$0xff]  ;;  %v668_v2 = vmov 0   ;;  %v281_v3 = vld [vmem:[%s859_s2 + $0x8] sm:$0xff]  ;;  %s272_s18 = scalar_select %p271_p10, %s733_s6, 1  ;;  %v276_v4 = vld [vmem:[%s858_s1] sm:$0xff]  ;;  %vm304_vm0 = vcmask 64512  }
  0x17   : > { %602 = vset.pattern.permute.xlu1 %v668_v2  ;;  %601 = vset.pattern.permute.xlu0 %v668_v2  ;;  %v279_v5 = vld [vmem:[%s858_s1 + $0x18] sm:$0xff]  ;;  %v282_v7 = vld [vmem:[%s859_s2 + $0x10] sm:$0xff]  ;;  %v280_v8 = vld [vmem:[%s859_s2] sm:$0xff]  ;;  %vm386_vm5 = vcmask 261120   ;;  %p621_p11 = scmp.ne.s32.totalorder %s619_s16, %s620_s17 }
  0x18   : > { %301 = vperm.xlu0 %601, %v283_v1   ;;  %291 = vperm.xlu1 %602, %v281_v3   ;;  %s544_s19 = sshll.u32 %s272_s18, 3  ;;  %v277_v9 = vld [vmem:[%s858_s1 + $0x8] sm:$0xff]  ;;  %v362_v11 = vld [vmem:[%s861_s4] sm:$0xff]  ;;  %v278_v12 = vld [vmem:[%s858_s1 + $0x10] sm:$0xff] }
  0x19   : > { %603 = vset.pattern.permute.xlu2 %v668_v2  ;;  %s274_s22 = scalar_lea.vmem %s857_s0, %s544_s19  ;;  %v363_v10 = vld [vmem:[%s861_s4 + $0x8] sm:$0xff]  ;;  %v365_v14 = vld [vmem:[%s861_s4 + $0x18] sm:$0xff]  ;;  %v364_v21 = vld [vmem:[%s861_s4 + $0x10] sm:$0xff]  ;;  %p622_p12 = pnand %p621_p11, %p750_p5 }
  0x1a   : > { %v275_v6 = vld [vmem:[%s274_s22] sm:$0xff]  ;;  %383 = vperm.xlu2 %603, %v365_v14   ;;  %v360_v36 = vld [vmem:[%s860_s3 + $0x10] sm:$0xff]  ;;  %v359_v38 = vld [vmem:[%s860_s3 + $0x8] sm:$0xff]  ;;  %s624_s19 = scalar_lea.hbm %s864_s7, 2 }
  0x1b   : > { %332 = vmatpush.msra.mxu0 %v275_v6  ;;  %556 = vmatpush.msra.mxu2 %v275_v6  ;;  %v441_v29 = vld [vmem:[#allocation2] sm:$0x1]  ;;  %v361_v39 = vld [vmem:[%s860_s3 + $0x18] sm:$0xff]  ;;  %p623_p13 = pneg %p622_p12  ;;  %p626_p1 = scmp.lt.s32.totalorder %s624_s19, %s620_s17 }
  0x1c   : > { %545 = vmatmul.msk.f32.vlgmr.msra.gmra.mxu0 %vm304_vm0, %v276_v4  ;;  %548 = vmatmul.msk.f32.vlgmr.msra.gmra.mxu2 %vm304_vm0, %v279_v5  ;;  %v358_v35 = vld [vmem:[%s860_s3] sm:$0xff] }
  0x1d   : > { %v440_v59 = vld [vmem:[%s862_s5] sm:$0x1]  ;;  %p627_p2 = por %p626_p1, %p625_p0 }
  0x1f   : > { %p628_p3 = pnand %p627_p2, %p623_p13 }
  0x20   : > { %296 = vperm.xlu0 %601, %v282_v7   ;;  %286 = vperm.xlu1 %602, %v280_v8  }
  0x22   : > { %378 = vperm.xlu2 %603, %v364_v21  }
  0x24   : > { %546 = vmatmul.msk.f32.gmra.mxu0 %vm304_vm0, %v277_v9 }
  0x28   : > { %373 = vperm.xlu0 %601, %v363_v10   ;;  %368 = vperm.xlu1 %602, %v362_v11  }
  0x2a   : > { %444 = vperm.xlu2 %603, %v441_v29  }
  0x2c   : > { %547 = vmatmul.msk.f32.gmra.mxu0 %vm304_vm0, %v278_v12 }
  0x74   : > { %v384_v40 = vpop.permute.xlu2 %383 }
  0x7c   : > { %v379_v43 = vpop.permute.xlu2 %378 }
  0x84   : > { %v445_v61 = vpop.permute.xlu2 %444 }
  0x85   : > { %v447_v62 = vperm.slane %v445_v61, 0 }
  0x8a   : > { %v292_v15 = vpop.permute.xlu1 %291  ;;  %v302_v16 = vpop.permute.xlu0 %301 }
  0x92   : > { %v287_v23 = vpop.permute.xlu1 %286  ;;  %v297_v25 = vpop.permute.xlu0 %296 }
  0x99   : > { %v334_v13 = vpop.f32.mrf.mxu0 }
  0x9a   : > { %v335_v27 = vadd.f32 %v334_v13, %v287_v23  ;;  %v374_v46 = vpop.permute.xlu0 %373  ;;  %v369_v50 = vpop.permute.xlu1 %368 }
  0x9c   : > { %v350_v33 = vmul.f32 0.01, %v335_v27  ;;  %vm346_vm4 = vcmp.gt.f32.partialorder %v335_v27, 0.0 }
  0x9e   : > { %v354_v37 = vsel %vm346_vm4, %v335_v27, %v350_v33 }
  0x9f   : > { %v343_v17 = vpop.f32.mrf.mxu2 }
  0xa0   : > { %v344_v18 = vadd.f32 %v343_v17, %v302_v16 }
  0xa1   : > { %v337_v19 = vpop.f32.mrf.mxu0 }
  0xa2   : > { %vm349_vm1 = vcmp.gt.f32.partialorder %v344_v18, 0.0  ;;  %v353_v20 = vmul.f32 0.01, %v344_v18  ;;  %v338_v24 = vadd.f32 %v337_v19, %v292_v15 }
  0xa4   : > { %v357_v22 = vsel %vm349_vm1, %v344_v18, %v353_v20  ;;  %v351_v31 = vmul.f32 0.01, %v338_v24  ;;  %vm347_vm3 = vcmp.gt.f32.partialorder %v338_v24, 0.0 }
  0xa5   : > { %411 = vmatpush.msra.mxu1 %v357_v22  ;;  %557 = vmatpush.msra.mxu3 %v357_v22 }
  0xa6   : > { %v355_v34 = vsel %vm347_vm3, %v338_v24, %v351_v31 }
  0xa9   : > { %v340_v26 = vpop.f32.mrf.mxu0 }
  0xaa   : > { %v341_v28 = vadd.f32 %v340_v26, %v297_v25 }
  0xac   : > { %vm348_vm2 = vcmp.gt.f32.partialorder %v341_v28, 0.0  ;;  %v352_v30 = vmul.f32 0.01, %v341_v28 }
  0xae   : > { %v356_v32 = vsel %vm348_vm2, %v341_v28, %v352_v30 }
  0xaf   : > { %412 = vmatpush.msra.mxu1 %v356_v32  ;;  %558 = vmatpush.msra.mxu3 %v356_v32 }
  0xb1   : > { %413 = vmatpush.msra.mxu1 %v355_v34  ;;  %559 = vmatpush.msra.mxu3 %v355_v34 }
  0xb3   : > { %414 = vmatpush.msra.mxu1 %v354_v37  ;;  %560 = vmatpush.msra.mxu3 %v354_v37 }
  0xb4   : > { %549 = vmatmul.msk.f32.vlgmr.msra.gmra.mxu1 %vm386_vm5, %v358_v35  ;;  %551 = vmatmul.msk.f32.vlgmr.msra.gmra.mxu3 %vm386_vm5, %v360_v36 }
  0xbc   : > { %550 = vmatmul.msk.f32.gmra.mxu1 %vm386_vm5, %v359_v38  ;;  %552 = vmatmul.msk.f32.gmra.mxu3 %vm386_vm5, %v361_v39 }
 0x131   : > { %v416_v41 = vpop.f32.mrf.mxu1 }
 0x132   : > { %v417_v51 = vadd.f32 %v416_v41, %v369_v50 }
 0x134   : > { %v432_v57 = vmul.f32 0.01, %v417_v51  ;;  %vm428_vm9 = vcmp.gt.f32.partialorder %v417_v51, 0.0 }
 0x136   : > { %v436_v60 = vsel %vm428_vm9, %v417_v51, %v432_v57 }
 0x137   : > { %v422_v42 = vpop.f32.mrf.mxu3 }
 0x138   : > { %v423_v45 = vadd.f32 %v422_v42, %v379_v43 }
 0x139   : > { %v419_v44 = vpop.f32.mrf.mxu1 }
 0x13a   : > { %v420_v48 = vadd.f32 %v419_v44, %v374_v46  ;;  %v434_v53 = vmul.f32 0.01, %v423_v45  ;;  %vm430_vm7 = vcmp.gt.f32.partialorder %v423_v45, 0.0 }
 0x13c   : > { %v433_v55 = vmul.f32 0.01, %v420_v48  ;;  %vm429_vm8 = vcmp.gt.f32.partialorder %v420_v48, 0.0  ;;  %v438_v56 = vsel %vm430_vm7, %v423_v45, %v434_v53 }
 0x13e   : > { %v437_v58 = vsel %vm429_vm8, %v420_v48, %v433_v55 }
 0x13f   : > { %v425_v47 = vpop.f32.mrf.mxu3 }
 0x140   : > { %v426_v49 = vadd.f32 %v425_v47, %v384_v40 }
 0x142   : > { %vm431_vm6 = vcmp.gt.f32.partialorder %v426_v49, 0.0  ;;  %v435_v52 = vmul.f32 0.01, %v426_v49 }
 0x144   : > { %v439_v54 = vsel %vm431_vm6, %v426_v49, %v435_v52 }
 0x145   : > { %463 = vmatpush.msrb.mxu2 %v439_v54 }
 0x147   : > { %464 = vmatpush.msrb.mxu2 %v438_v56 }
 0x149   : > { %465 = vmatpush.msrb.mxu2 %v437_v58 }
 0x14b   : > { %466 = vmatpush.msrb.mxu2 %v436_v60 }
 0x14c   : > { %553 = vmatmul.msk.f32.vlgmr.msrb.gmra.mxu2 %vm386_vm5, %v440_v59 }
 0x1cf   : > { %v468_v63 = vpop.f32.mrf.mxu2 }
 0x1d0   : > { %v469_v0 = vadd.f32 %v468_v63, %v447_v62 }
 0x1d2   : > { %471 = vst [vmem:[%s270_s9] sm:$0x1] %v469_v0 }
 0x1d3   : > { %631 = shalt.err (!%p628_p3)
}
 0x1d4   : > { %561 = dma.vmem_to_hbm [thread:$0]  (%p750_p5), %s484_s10, 16, %s486_s14, %s473_s15  }
 0x1d5 PF: > { %p567_p4 = scmp.ge.s32.totalorder %s666_s29, 2  ;;  %s497_s22 = sand.u32 1, %s654_s26  }
 0x1d6   : > { %s498_s23 = scalar_lea.sflag [#allocation4], %s497_s22 }
 0x1d7   : > { %p564_p7 = pnand %p567_p4, %p754_p6 }
 0x1d9   : > { %p565_p8 = pneg %p564_p7 }
 0x1db   : > { %649 = dma.done.wait (%p565_p8), %s498_s23, 16  }
 0x1dc   : > { %651 = vsyncadd (%p565_p8), %s498_s23, 4294967280  ;;  %p19_p9 = scmp.ge.s32.totalorder %s737_s8, 4   ;;  %s867_s26 = smov %s658_s27 }
 0x1dd   : > { %s868_s27 = smov %s662_s28  ;;  %s869_s28 = smov %s748_s11 }
 0x1de   : > { %s870_s29 = smov %s737_s8  ;;  %21 = sbr.rel (!%p19_p9) target bundleno = 6 (0x6), region = 83 }
 0x1e3   :  { %503 = vsyncpa [#allocation4], 1 }
 0x1e4   :  { %505 = vsyncpa [#allocation4 + $0x1], 1 }

</bundles_post_ra>
